<compile_context>
chip_gen: v6e
topology: v6e:2x2x1
jax: 0.10.0
libtpu: 0.0.40
codegen_flags: <defaults>
</compile_context>

<pallas_src>
import functools

import jax
import jax.numpy as jnp
from jax import lax
from jax.experimental import pallas as pl
from jax.experimental.pallas import tpu as pltpu


def xca_kernel(x_ref, wqkv_ref, bqkv_ref, wp_ref, bp_ref, tempc_ref,
               hrow_ref, hcol_ref, o_ref):
    cp = o_ref.shape[-1]                              # padded channel count
    x = x_ref[...]                                    # (N, C) bf16

    # Fused q/k/v projection: one MXU pass over x, f32 accumulation + bias,
    # then free 128-aligned lane slices of the (N, 3*Cp) result.
    qkv = jnp.dot(x, wqkv_ref[...], preferred_element_type=jnp.float32) + bqkv_ref[...]
    q = qkv[:, :cp]
    k = qkv[:, cp:2 * cp]
    v_bf = qkv[:, 2 * cp:].astype(jnp.bfloat16)       # v only ever feeds the MXU

    # F.normalize(dim=-1) of the per-head (d, N) views == L2-normalize each
    # channel (column) over tokens.  1/max(||.||, eps) == rsqrt(max(ss, eps^2)).
    eps2 = jnp.float32(1e-24)                         # (1e-12)^2, F.normalize eps
    inv_q = lax.rsqrt(jnp.maximum(jnp.sum(q * q, axis=0, keepdims=True), eps2))
    inv_k = lax.rsqrt(jnp.maximum(jnp.sum(k * k, axis=0, keepdims=True), eps2))

    qn = (q * inv_q).astype(jnp.bfloat16)
    k_bf = k.astype(jnp.bfloat16)                     # f32 k dead after inv_k

    # Cross-covariance over tokens: g[c1, c2] = sum_n qn[n, c1] * k[n, c2].
    g = lax.dot_general(qn, k_bf, (((0,), (0,)), ((), ())),
                        preferred_element_type=jnp.float32)             # (Cp, Cp)

    # Block-diagonal head mask built in-kernel from two tiny head-id vectors
    # (0 within a head, -1e30 across heads / into the pad channels).
    mask = jnp.where(hrow_ref[...] == hcol_ref[...],
                     jnp.float32(0.0), jnp.float32(-1e30))              # (Cp, Cp)

    # k-side normalization + per-head temperature folded into one column scale
    # (exact on the block diagonal, which is all that survives the mask).
    logits = g * (inv_k * tempc_ref[...]) + mask

    # Row softmax in f32 (masked entries underflow to exactly 0).
    m = jnp.max(logits, axis=-1, keepdims=True)
    e = jnp.exp(logits - m)
    p = e * pl.reciprocal(jnp.sum(e, axis=-1, keepdims=True), approx=True)

    # Channel mixing: y[n, c1] = sum_c2 p[c1, c2] * v[n, c2]  ==  v @ p^T.
    y = lax.dot_general(v_bf, p.astype(jnp.bfloat16), (((1,), (1,)), ((), ())),
                        preferred_element_type=jnp.float32)             # (N, Cp)

    # Output projection (lane-dense Cp-wide store).
    out = jnp.dot(y.astype(jnp.bfloat16), wp_ref[...],
                  preferred_element_type=jnp.float32) + bp_ref[...]
    o_ref[...] = out.astype(o_ref.dtype)


def _const_spec(shape):
    """BlockSpec for a grid-invariant operand; single-buffered when supported."""
    index_map = lambda b: (0,) * len(shape)
    if hasattr(pl, "Buffered"):
        try:
            return pl.BlockSpec(shape, index_map, pipeline_mode=pl.Buffered(1))
        except TypeError:
            pass  # older Pallas without pipeline_mode: default double buffering
    return pl.BlockSpec(shape, index_map)


def _vmem_limit_bytes():
    """~80% of the chip's VMEM (64 MiB on v7x, 128 MiB on v5e/v6e)."""
    cap = 64 * 1024 * 1024
    try:
        cap = int(getattr(pltpu.get_tpu_info(), "vmem_capacity_bytes", cap))
    except Exception:
        pass
    return int(cap * 4 // 5)


@functools.partial(jax.jit, static_argnames=("out_dtype",))
def xca_forward(x, wqkv_t, bqkv, wproj_t, bproj, temp, out_dtype=None):
    B, N, C = x.shape
    H = temp.shape[0]
    d = C // H
    out_dtype = x.dtype if out_dtype is None else out_dtype

    # Pad the channel axis up to a lane-dense multiple of 128 (zeros; padded
    # channels are mathematically inert -- see header comment).
    Cp = ((C + 127) // 128) * 128
    padc = Cp - C

    # Split the fused qkv weight, pad each projection's output dim to Cp, and
    # re-fuse so the kernel does a single (N,C)@(C,3Cp) matmul.  MXU operands
    # (weights, x) in bf16; biases/scales stay f32.
    wq = jnp.pad(wqkv_t[:, :C],      ((0, 0), (0, padc)))
    wk = jnp.pad(wqkv_t[:, C:2 * C], ((0, 0), (0, padc)))
    wv = jnp.pad(wqkv_t[:, 2 * C:],  ((0, 0), (0, padc)))
    w_qkv = jnp.concatenate([wq, wk, wv], axis=1).astype(jnp.bfloat16)   # (C, 3Cp)

    bq = jnp.pad(bqkv[:, :C],      ((0, 0), (0, padc)))
    bk = jnp.pad(bqkv[:, C:2 * C], ((0, 0), (0, padc)))
    bv = jnp.pad(bqkv[:, 2 * C:],  ((0, 0), (0, padc)))
    b_qkv = jnp.concatenate([bq, bk, bv], axis=1)                        # (1, 3Cp) f32

    wp = jnp.pad(wproj_t, ((0, padc), (0, padc))).astype(jnp.bfloat16)   # (Cp, Cp)
    bp = jnp.pad(bproj, ((0, 0), (0, padc)))                             # (1, Cp) f32

    # Per-channel temperature (temperature of the channel's head; 1.0 for pad
    # channels) and the per-channel head ids used to build the block-diagonal
    # mask in-kernel (pad channels land in head ids >= H, isolating them).
    tempc = jnp.pad(jnp.repeat(temp.astype(jnp.float32), d), (0, padc),
                    constant_values=1.0).reshape(1, Cp)
    head_id = (jnp.arange(Cp, dtype=jnp.int32) // d).astype(jnp.int32)
    hrow = head_id.reshape(Cp, 1)
    hcol = head_id.reshape(1, Cp)

    x_bf = x.astype(jnp.bfloat16)

    x_spec = pl.BlockSpec((None, N, C), lambda b: (b, 0, 0))    # squeezed batch
    o_spec = pl.BlockSpec((None, N, Cp), lambda b: (b, 0, 0))   # lane-dense store

    out = pl.pallas_call(
        xca_kernel,
        out_shape=jax.ShapeDtypeStruct((B, N, Cp), out_dtype),
        grid=(B,),
        in_specs=[
            x_spec,                       # x
            _const_spec((C, 3 * Cp)),     # fused qkv weight
            _const_spec((1, 3 * Cp)),     # fused qkv bias
            _const_spec((Cp, Cp)),        # proj weight
            _const_spec((1, Cp)),         # proj bias
            _const_spec((1, Cp)),         # per-channel temperature
            _const_spec((Cp, 1)),         # head id (rows)
            _const_spec((1, Cp)),         # head id (cols)
        ],
        out_specs=o_spec,
        # Batch axis is "parallel": with B >= 2 both v7x TensorCores are used.
        compiler_params=pltpu.CompilerParams(
            dimension_semantics=("parallel",),
            vmem_limit_bytes=_vmem_limit_bytes()),
    )(x_bf, w_qkv, b_qkv, wp, bp, tempc, hrow, hcol)

    return out[..., :C] if padc else out


def xca_reference(x, wqkv_t, bqkv, wproj_t, bproj, temp):
    """Pure-JAX f32 mirror of the PyTorch forward (for verification)."""
    B, N, C = x.shape
    H = temp.shape[0]
    d = C // H
    qkv = x @ wqkv_t + bqkv[0]                                  # (B, N, 3C)
    qkv = qkv.reshape(B, N, 3, H, d).transpose(2, 0, 3, 1, 4)   # (3, B, H, N, d)
    q = jnp.swapaxes(qkv[0], -2, -1)                            # (B, H, d, N)
    k = jnp.swapaxes(qkv[1], -2, -1)
    v = jnp.swapaxes(qkv[2], -2, -1)
    q = q / jnp.maximum(jnp.linalg.norm(q, axis=-1, keepdims=True), 1e-12)
    k = k / jnp.maximum(jnp.linalg.norm(k, axis=-1, keepdims=True), 1e-12)
    attn = (q @ jnp.swapaxes(k, -2, -1)) * temp[None, :, None, None]
    attn = jax.nn.softmax(attn, axis=-1)
    out = (attn @ v).transpose(0, 3, 1, 2).reshape(B, N, C)     # (B, N, C)
    return out @ wproj_t + bproj[0]


if __name__ == "__main__":
    B, N, C, H = 2, 16, 32, 4

    key = jax.random.PRNGKey(0)
    k1, k2, k3, k4, k5 = jax.random.split(key, 5)

    x = jax.random.normal(k1, (B, N, C), dtype=jnp.float32)
    # nn.Linear(dim, dim*3): weight (3C, C); stored transposed (C, 3C) for x @ W^T.
    wqkv_t = jax.random.normal(k2, (C, 3 * C), dtype=jnp.float32) * 0.05
    bqkv = jax.random.normal(k3, (1, 3 * C), dtype=jnp.float32) * 0.05
    # nn.Linear(dim, dim): weight (C, C); stored transposed.
    wproj_t = jax.random.normal(k4, (C, C), dtype=jnp.float32) * 0.05
    bproj = jax.random.normal(k5, (1, C), dtype=jnp.float32) * 0.05
    # temperature: nn.Parameter(ones(heads, 1, 1)); use a non-trivial per-head
    # scale, stored flat as (H,).
    temp = 1.0 + 0.1 * jnp.arange(H, dtype=jnp.float32)

    out = jax.block_until_ready(xca_forward(x, wqkv_t, bqkv, wproj_t, bproj, temp))
    ref = xca_reference(x, wqkv_t, bqkv, wproj_t, bproj, temp)

    assert out.shape == (B, N, C)
    # bf16 MXU operands + approx EUP reciprocal vs. an all-f32 reference
    # -> loosened tolerance.
    err = float(jnp.max(jnp.abs(out - ref)))
    assert jnp.allclose(out, ref, atol=2e-2, rtol=2e-2), err

    print("KERNEL_OK")
</pallas_src>

<mosaic_0001>
module attributes {stable_mosaic.version = 11 : i64} {
  func.func @xca_kernel(%arg0: i32, %arg1: memref<1x16x32xbf16, #tpu.memory_space<vmem>>, %arg2: memref<32x384xbf16, #tpu.memory_space<vmem>>, %arg3: memref<1x384xf32, #tpu.memory_space<vmem>>, %arg4: memref<128x128xbf16, #tpu.memory_space<vmem>>, %arg5: memref<1x128xf32, #tpu.memory_space<vmem>>, %arg6: memref<1x128xf32, #tpu.memory_space<vmem>>, %arg7: memref<128x1xi32, #tpu.memory_space<vmem>>, %arg8: memref<1x128xi32, #tpu.memory_space<vmem>>, %arg9: memref<1x16x128xf32, #tpu.memory_space<vmem>>) attributes {dimension_semantics = [#tpu.dimension_semantics<parallel>], iteration_bounds = array<i64: 2>, scalar_prefetch = 0 : i64, scratch_operands = 0 : i64, tpu.core_type = #tpu.core_type<tc>, window_params = [{transform_indices = @transform_0, window_bounds = array<i64: 1, 16, 32>}, {pipeline_mode = #tpu.pipeline_mode<synchronous>, transform_indices = @transform_1, window_bounds = array<i64: 32, 384>}, {pipeline_mode = #tpu.pipeline_mode<synchronous>, transform_indices = @transform_2, window_bounds = array<i64: 1, 384>}, {pipeline_mode = #tpu.pipeline_mode<synchronous>, transform_indices = @transform_3, window_bounds = array<i64: 128, 128>}, {pipeline_mode = #tpu.pipeline_mode<synchronous>, transform_indices = @transform_4, window_bounds = array<i64: 1, 128>}, {pipeline_mode = #tpu.pipeline_mode<synchronous>, transform_indices = @transform_5, window_bounds = array<i64: 1, 128>}, {pipeline_mode = #tpu.pipeline_mode<synchronous>, transform_indices = @transform_6, window_bounds = array<i64: 128, 1>}, {pipeline_mode = #tpu.pipeline_mode<synchronous>, transform_indices = @transform_7, window_bounds = array<i64: 1, 128>}, {transform_indices = @transform_8, window_bounds = array<i64: 1, 16, 128>}]} {
    %c0 = arith.constant 0 : index
    %c0_0 = arith.constant 0 : index
    %c0_1 = arith.constant 0 : index
    %0 = vector.load %arg1[%c0, %c0_0, %c0_1] : memref<1x16x32xbf16, #tpu.memory_space<vmem>>, vector<1x16x32xbf16>
    %1 = vector.shape_cast %0 : vector<1x16x32xbf16> to vector<16x32xbf16>
    %c0_2 = arith.constant 0 : index
    %c0_3 = arith.constant 0 : index
    %2 = vector.load %arg2[%c0_2, %c0_3] : memref<32x384xbf16, #tpu.memory_space<vmem>>, vector<32x384xbf16>
    %cst = arith.constant dense<0.000000e+00> : vector<16x384xf32>
    %3 = tpu.matmul %1, %2, %cst {dimension_numbers = #tpu.dot_dimension_numbers<[1], [0], [0], [1], [0, 0, 1, 1], [], []>} : vector<16x32xbf16>, vector<32x384xbf16>, vector<16x384xf32> -> vector<16x384xf32>
    %c0_4 = arith.constant 0 : index
    %c0_5 = arith.constant 0 : index
    %4 = vector.load %arg3[%c0_4, %c0_5] : memref<1x384xf32, #tpu.memory_space<vmem>>, vector<1x384xf32>
    %5 = vector.broadcast %4 : vector<1x384xf32> to vector<16x384xf32>
    %6 = arith.addf %3, %5 : vector<16x384xf32>
    %7 = vector.extract_strided_slice %6 {offsets = [0, 0], sizes = [16, 128], strides = [1, 1]} : vector<16x384xf32> to vector<16x128xf32>
    %8 = vector.extract_strided_slice %6 {offsets = [0, 128], sizes = [16, 128], strides = [1, 1]} : vector<16x384xf32> to vector<16x128xf32>
    %9 = vector.extract_strided_slice %6 {offsets = [0, 256], sizes = [16, 128], strides = [1, 1]} : vector<16x384xf32> to vector<16x128xf32>
    %10 = arith.truncf %9 : vector<16x128xf32> to vector<16x128xbf16>
    %11 = arith.mulf %7, %7 : vector<16x128xf32>
    %cst_6 = arith.constant dense<0.000000e+00> : vector<128xf32>
    %12 = vector.multi_reduction <add>, %11, %cst_6 [0] : vector<16x128xf32> to vector<128xf32>
    %13 = vector.shape_cast %12 : vector<128xf32> to vector<1x128xf32>
    %cst_7 = arith.constant 1.000000e-24 : f32
    %14 = vector.broadcast %cst_7 : f32 to vector<1x128xf32>
    %15 = arith.maximumf %13, %14 : vector<1x128xf32>
    %16 = math.rsqrt %15 : vector<1x128xf32>
    %17 = arith.mulf %8, %8 : vector<16x128xf32>
    %cst_8 = arith.constant dense<0.000000e+00> : vector<128xf32>
    %18 = vector.multi_reduction <add>, %17, %cst_8 [0] : vector<16x128xf32> to vector<128xf32>
    %19 = vector.shape_cast %18 : vector<128xf32> to vector<1x128xf32>
    %cst_9 = arith.constant 1.000000e-24 : f32
    %20 = vector.broadcast %cst_9 : f32 to vector<1x128xf32>
    %21 = arith.maximumf %19, %20 : vector<1x128xf32>
    %22 = math.rsqrt %21 : vector<1x128xf32>
    %23 = vector.broadcast %16 : vector<1x128xf32> to vector<16x128xf32>
    %24 = arith.mulf %7, %23 : vector<16x128xf32>
    %25 = arith.truncf %24 : vector<16x128xf32> to vector<16x128xbf16>
    %26 = arith.truncf %8 : vector<16x128xf32> to vector<16x128xbf16>
    %cst_10 = arith.constant dense<0.000000e+00> : vector<128x128xf32>
    %27 = tpu.matmul %25, %26, %cst_10 {dimension_numbers = #tpu.dot_dimension_numbers<[0], [0], [1], [1], [0, 1, 1, 1], [], []>} : vector<16x128xbf16>, vector<16x128xbf16>, vector<128x128xf32> -> vector<128x128xf32>
    %c0_11 = arith.constant 0 : index
    %c0_12 = arith.constant 0 : index
    %28 = vector.load %arg7[%c0_11, %c0_12] : memref<128x1xi32, #tpu.memory_space<vmem>>, vector<128x1xi32>
    %c0_13 = arith.constant 0 : index
    %c0_14 = arith.constant 0 : index
    %29 = vector.load %arg8[%c0_13, %c0_14] : memref<1x128xi32, #tpu.memory_space<vmem>>, vector<1x128xi32>
    %30 = vector.broadcast %28 : vector<128x1xi32> to vector<128x128xi32>
    %31 = vector.broadcast %29 : vector<1x128xi32> to vector<128x128xi32>
    %32 = arith.cmpi eq, %30, %31 : vector<128x128xi32>
    %cst_15 = arith.constant 0.000000e+00 : f32
    %cst_16 = arith.constant -1.000000e+30 : f32
    %33 = vector.broadcast %cst_15 : f32 to vector<128x128xf32>
    %34 = vector.broadcast %cst_16 : f32 to vector<128x128xf32>
    %35 = arith.select %32, %33, %34 : vector<128x128xi1>, vector<128x128xf32>
    %c0_17 = arith.constant 0 : index
    %c0_18 = arith.constant 0 : index
    %36 = vector.load %arg6[%c0_17, %c0_18] : memref<1x128xf32, #tpu.memory_space<vmem>>, vector<1x128xf32>
    %37 = arith.mulf %22, %36 : vector<1x128xf32>
    %38 = vector.broadcast %37 : vector<1x128xf32> to vector<128x128xf32>
    %39 = arith.mulf %27, %38 : vector<128x128xf32>
    %40 = arith.addf %39, %35 : vector<128x128xf32>
    %cst_19 = arith.constant dense<0xFF800000> : vector<128xf32>
    %41 = vector.multi_reduction <maximumf>, %40, %cst_19 [1] : vector<128x128xf32> to vector<128xf32>
    %42 = vector.shape_cast %41 : vector<128xf32> to vector<128x1xf32>
    %43 = vector.broadcast %42 : vector<128x1xf32> to vector<128x128xf32>
    %44 = arith.subf %40, %43 : vector<128x128xf32>
    %45 = math.exp %44 : vector<128x128xf32>
    %cst_20 = arith.constant dense<0.000000e+00> : vector<128xf32>
    %46 = vector.multi_reduction <add>, %45, %cst_20 [1] : vector<128x128xf32> to vector<128xf32>
    %47 = vector.shape_cast %46 : vector<128xf32> to vector<128x1xf32>
    %48 = tpu.reciprocal %47 {approx = true} : vector<128x1xf32> -> vector<128x1xf32>
    %49 = vector.broadcast %48 : vector<128x1xf32> to vector<128x128xf32>
    %50 = arith.mulf %45, %49 : vector<128x128xf32>
    %51 = arith.truncf %50 : vector<128x128xf32> to vector<128x128xbf16>
    %cst_21 = arith.constant dense<0.000000e+00> : vector<16x128xf32>
    %52 = tpu.matmul %10, %51, %cst_21 {dimension_numbers = #tpu.dot_dimension_numbers<[1], [1], [0], [0], [0, 0, 1, 0], [], []>} : vector<16x128xbf16>, vector<128x128xbf16>, vector<16x128xf32> -> vector<16x128xf32>
    %53 = arith.truncf %52 : vector<16x128xf32> to vector<16x128xbf16>
    %c0_22 = arith.constant 0 : index
    %c0_23 = arith.constant 0 : index
    %54 = vector.load %arg4[%c0_22, %c0_23] : memref<128x128xbf16, #tpu.memory_space<vmem>>, vector<128x128xbf16>
    %cst_24 = arith.constant dense<0.000000e+00> : vector<16x128xf32>
    %55 = tpu.matmul %53, %54, %cst_24 {dimension_numbers = #tpu.dot_dimension_numbers<[1], [0], [0], [1], [0, 0, 1, 1], [], []>} : vector<16x128xbf16>, vector<128x128xbf16>, vector<16x128xf32> -> vector<16x128xf32>
    %c0_25 = arith.constant 0 : index
    %c0_26 = arith.constant 0 : index
    %56 = vector.load %arg5[%c0_25, %c0_26] : memref<1x128xf32, #tpu.memory_space<vmem>>, vector<1x128xf32>
    %57 = vector.broadcast %56 : vector<1x128xf32> to vector<16x128xf32>
    %58 = arith.addf %55, %57 : vector<16x128xf32>
    %c0_27 = arith.constant 0 : index
    %c0_28 = arith.constant 0 : index
    %c0_29 = arith.constant 0 : index
    %59 = vector.load %arg9[%c0_27, %c0_28, %c0_29] : memref<1x16x128xf32, #tpu.memory_space<vmem>>, vector<1x16x128xf32>
    %60 = vector.shape_cast %59 : vector<1x16x128xf32> to vector<16x128xf32>
    %61 = vector.shape_cast %58 : vector<16x128xf32> to vector<1x16x128xf32>
    tpu.vector_store %arg9[%c0_27, %c0_28, %c0_29], %61 {strides = array<i32>} : memref<1x16x128xf32, #tpu.memory_space<vmem>>, vector<1x16x128xf32>,
    return
  }
  func.func @transform_0(%arg0: i32) -> (i32, i32, i32) {
    %c0_i32 = arith.constant 0 : i32
    %c0_i32_0 = arith.constant 0 : i32
    %c0_i32_1 = arith.constant 0 : i32
    return %arg0, %c0_i32, %c0_i32_0 : i32, i32, i32
  }
  func.func @transform_1(%arg0: i32) -> (i32, i32) {
    %c0_i32 = arith.constant 0 : i32
    %c0_i32_0 = arith.constant 0 : i32
    %c0_i32_1 = arith.constant 0 : i32
    return %c0_i32, %c0_i32_0 : i32, i32
  }
  func.func @transform_2(%arg0: i32) -> (i32, i32) {
    %c0_i32 = arith.constant 0 : i32
    %c0_i32_0 = arith.constant 0 : i32
    %c0_i32_1 = arith.constant 0 : i32
    return %c0_i32, %c0_i32_0 : i32, i32
  }
  func.func @transform_3(%arg0: i32) -> (i32, i32) {
    %c0_i32 = arith.constant 0 : i32
    %c0_i32_0 = arith.constant 0 : i32
    %c0_i32_1 = arith.constant 0 : i32
    return %c0_i32, %c0_i32_0 : i32, i32
  }
  func.func @transform_4(%arg0: i32) -> (i32, i32) {
    %c0_i32 = arith.constant 0 : i32
    %c0_i32_0 = arith.constant 0 : i32
    %c0_i32_1 = arith.constant 0 : i32
    return %c0_i32, %c0_i32_0 : i32, i32
  }
  func.func @transform_5(%arg0: i32) -> (i32, i32) {
    %c0_i32 = arith.constant 0 : i32
    %c0_i32_0 = arith.constant 0 : i32
    %c0_i32_1 = arith.constant 0 : i32
    return %c0_i32, %c0_i32_0 : i32, i32
  }
  func.func @transform_6(%arg0: i32) -> (i32, i32) {
    %c0_i32 = arith.constant 0 : i32
    %c0_i32_0 = arith.constant 0 : i32
    %c0_i32_1 = arith.constant 0 : i32
    return %c0_i32, %c0_i32_0 : i32, i32
  }
  func.func @transform_7(%arg0: i32) -> (i32, i32) {
    %c0_i32 = arith.constant 0 : i32
    %c0_i32_0 = arith.constant 0 : i32
    %c0_i32_1 = arith.constant 0 : i32
    return %c0_i32, %c0_i32_0 : i32, i32
  }
  func.func @transform_8(%arg0: i32) -> (i32, i32, i32) {
    %c0_i32 = arith.constant 0 : i32
    %c0_i32_0 = arith.constant 0 : i32
    %c0_i32_1 = arith.constant 0 : i32
    return %arg0, %c0_i32, %c0_i32_0 : i32, i32, i32
  }
}

</mosaic_0001>

<bundles_post_ra>
// kernel: xca_forward.1
= control target key start
LH: loop header
LB: loop body
LE: loop exit
PB: predicated region body
PF: predicated region fallthrough
CT: control target
= control target key end

     0   :  { %13 = vsyncpa [#allocation3], 0  ;;  %s1996_s0 = inlined_call_operand.vmem [shape: bf16[2,16,32], index: 0, kind: input, shape index: {}]   ;;  %s1997_s1 = inlined_call_operand.vmem [shape: bf16[32,384], index: 1, kind: input, shape index: {}]   ;;  %s1998_s2 = inlined_call_operand.vmem [shape: f32[1,384], index: 2, kind: input, shape index: {}]   ;;  %s1999_s3 = inlined_call_operand.vmem [shape: bf16[128,128], index: 3, kind: input, shape index: {}]   ;;  %s2000_s4 = inlined_call_operand.vmem [shape: f32[1,128], index: 4, kind: input, shape index: {}]   ;;  %s2001_s5 = inlined_call_operand.vmem [shape: f32[1,128], index: 5, kind: input, shape index: {}]   ;;  %s2002_s6 = inlined_call_operand.vmem [shape: s32[128,1], index: 6, kind: input, shape index: {}]   ;;  %s2003_s7 = inlined_call_operand.vmem [shape: s32[1,128], index: 7, kind: input, shape index: {}]   ;;  %s2004_s8 = inlined_call_operand.hbm [shape: f32[2,16,128], index: 8, kind: output, shape index: {}]  }
   0x1   :  { %15 = vsyncpa [#allocation3 + $0x1], 0  ;;  %s1528_s27 = smov 0   ;;  %s1530_s28 = smov 0  }
   0x2   :  { %s1532_s29 = smov 0   ;;  %s1534_s30 = smov 0  }
   0x3 LB: > { %s1549_s9 = sadd.s32 4294967295, %s1474_s30   ;;  %s1145_s10 = sadd.s32 4294967294, %s1474_s30   ;;  %s1474_s30 = sphi %s1534_s30, %s2010_s30   ;;  %s1470_s29 = sphi %s1532_s29, %s2009_s29   ;;  %s1466_s28 = sphi %s1530_s28, %s2008_s28   ;;  %s1462_s27 = sphi %s1528_s27, %s2007_s27  }
   0x4   : > { %s1553_s11 = sadd.s32 1, %s1474_s30   ;;  %s201_s12 = sadd.s32 1, %s1470_s29 }
   0x5   : > { %s198_s13 = ssub.s32 %s1474_s30, %s1553_s11  ;;  %p211_p0 = scmp.ne.s32.totalorder %s1470_s29, %s1466_s28 }
   0x6   : > { %p199_p1 = scmp.eq.s32.totalorder %s198_s13, 0  ;;  %p212_p2 = scmp.eq.s32.totalorder %s1549_s9, 1 }
   0x7   : > { %p217_p3 = scmp.ne.s32.totalorder %s1466_s28, %s1462_s27  ;;  %p218_p4 = scmp.eq.s32.totalorder %s1145_s10, 1 }
   0x8   : > { %s1564_s14 = scalar_select %p199_p1, %s1470_s29, %s201_s12  }
   0x9   : > { %p1566_p5 = por %p212_p2, %p211_p0  ;;  %p1570_p6 = por %p218_p4, %p217_p3 }
   0xa   : > { %p1148_p7 = scmp.ge.s32.totalorder %s1474_s30, 1  ;;  %p265_p8 = scmp.lt.s32.totalorder %s1474_s30, 3 }
   0xc   : > { %p266_p9 = pnand %p1148_p7, %p265_p8 }
   0xd   : > { %p299_p10 = scmp.lt.s32.totalorder (!%p266_p9), %s1549_s9, 1 }
   0xe   : > { %269 = sbr.rel (%p266_p9) target bundleno = 1379 (0x563), region = 52 }
  0x13   : > { %v1329_v0 = vld [vmem:[%s1997_s1 + $0x1c] ss:$12 sps:$4 sm:$0xff]   ;;  %v1331_v1 = vld [vmem:[%s1997_s1 + $0x18] ss:$12 sps:$4 sm:$0xff]   ;;  %v1476_v2 = vmov 0   ;;  %s300_s23 = scalar_select %p299_p10, %s1549_s9, 1  ;;  %v317_v9 = vlaneseq }
  0x14   : > { %405 = vmatprep.mubr.bf16.mxu0 %v1476_v2  ;;  %1328 = vset.pattern.permute.xlu1 %v1476_v2  ;;  %v1332_v3 = vld [vmem:[%s1997_s1 + $0x4] ss:$12 sps:$4 sm:$0xff]   ;;  %v1334_v4 = vld [vmem:[%s1997_s1] ss:$12 sps:$4 sm:$0xff]   ;;  %vm369_vm0 = vcmask 261120   ;;  %v1477_v7 = vmov 0.0  }
  0x15   : > { %385 = vmatprep.subr.bf16.mxu0 %v1329_v0  ;;  %s1184_s26 = sshll.u32 %s300_s23, 3  ;;  %v1336_v6 = vld [vmem:[%s1997_s1 + $0x20] ss:$12 sps:$4 sm:$0xff]   ;;  %1242 = vmatprep.subr.bf16.mxu1 %v1477_v7  ;;  %v1337_v8 = vld [vmem:[%s1997_s1 + $0x8] ss:$12 sps:$4 sm:$0xff]   ;;  %vm1478_vm1 = vmmov 0  }
  0x16   : > { %386 = vmatpush1.bf16.msra.mxu0 %v1331_v1  ;;  %s303_s13 = scalar_lea.vmem %s1996_s0, %s1184_s26  ;;  %1258 = vmatprep.mubr.msk.bf16.mxu1 %vm1478_vm1, %v1477_v7  ;;  %v1608_v10 = vshrl.u32 %v317_v9, 7  ;;  %v315_v12 = vld [vmem:[%s1998_s2] sm:$0x7]  ;;  %v637_v42 = vld [vmem:[%s2002_s6 + $0x78] sm:$0xff]  ;;  %v635_v44 = vld [vmem:[%s2002_s6 + $0x68] sm:$0xff]  ;;  %vm500_vm2 = vcmask 130048  }
  0x17   : > { %387 = vmatprep.subr.bf16.mxu0 %v1332_v3  ;;  %v1335_v5 = vld [vmem:[%s303_s13] sm:$0xff]   ;;  %685 = vperm.xlu1 %1328, %v637_v42   ;;  %v632_v45 = vld [vmem:[%s2002_s6 + $0x50] sm:$0xff]  ;;  %v633_v46 = vld [vmem:[%s2002_s6 + $0x58] sm:$0xff]  ;;  %s296_s23 = sand.u32 1, %s1466_s28   ;;  %s1185_s13 = sshll.u32 %s1549_s9, 8 }
  0x18   : > { %v319_v11 = vsub.s32 0, %v1608_v10  ;;  %v323_v13 = vsub.s32 1, %v1608_v10  ;;  %v634_v43 = vld [vmem:[%s2002_s6 + $0x60] sm:$0xff]  ;;  %v631_v48 = vld [vmem:[%s2002_s6 + $0x48] sm:$0xff]  ;;  %v628_v49 = vld [vmem:[%s2002_s6 + $0x30] sm:$0xff]  ;;  %v327_v50 = vsub.s32 2, %v1608_v10  ;;  %s1954_s19 = scalar_lea.hbm %s2004_s8, %s1185_s13 }
  0x19   : > { %v630_v47 = vld [vmem:[%s2002_s6 + $0x40] sm:$0xff]  ;;  %v629_v51 = vld [vmem:[%s2002_s6 + $0x38] sm:$0xff]  ;;  %v636_v55 = vld [vmem:[%s2002_s6 + $0x70] sm:$0xff]  ;;  %s1149_s24 = sshll.u32 %s296_s23, 4  ;;  %s1956_s20 = scalar_lea.sflag [#allocation3], %s296_s23 }
  0x1a   : > { %388 = vmatpush1.bf16.msra.mxu0 %v1334_v4  ;;  %v320_v14 = vrot.slane %v315_v12, %v319_v11  ;;  %v324_v16 = vrot.slane %v315_v12, %v323_v13  ;;  %v328_v52 = vrot.slane %v315_v12, %v327_v50  ;;  %v626_v53 = vld [vmem:[%s2002_s6 + $0x20] sm:$0xff]  ;;  %v627_v58 = vld [vmem:[%s2002_s6 + $0x28] sm:$0xff]  ;;  %v624_v60 = vld [vmem:[%s2002_s6 + $0x10] sm:$0xff]  ;;  %s298_s10 = scalar_lea.vmem [#allocation2], %s1149_s24  ;;  %s1480_s9 = smov [#allocation2]  }
  0x1b   : > { %1216 = vmatprep.subr.bf16.mxu0 %v1477_v7  ;;  %676 = vperm.xlu1 %1328, %v634_v43   ;;  %v625_v0 = vld [vmem:[%s2002_s6 + $0x18] sm:$0xff]  ;;  %v622_v1 = vld [vmem:[%s2002_s6] sm:$0xff]  ;;  %s1083_s12 = sshll.u32 %s298_s10, 4  ;;  %s1418_s22 = sshll.u32 %s1480_s9, 4  ;;  %s1949_s12 = int_to_ptr.vmem [resolvable:$true] %s1083_s12  ;;  %s1419_s22 = int_to_ptr.vmem [resolvable:$false] %s1418_s22 }
  0x1c   : > { %v1712_v42 = vld [vmem:[%s2003_s7] ss:$0 sm:$0xff]  ;;  %s1414_s21 = scalar_lea.vmem %s1949_s12, 256  ;;  %s1420_s24 = scalar_lea.vmem %s1419_s22, 512 }
  0x1d   : > { %1159 = vmatmul.mubr.msk.bf16.vlgmr.msra.gmra.mxu0 %vm369_vm0, %v1335_v5  ;;  %p1415_p11 = scmp.ne.s32.totalorder %s1949_s12, %s1414_s21  ;;  %p1421_p0 = scmp.lt.s32.totalorder %s1949_s12, %s1419_s22 }
  0x1e   : > { %1217 = vmatpush3.bf16.msra.mxu0 %v1336_v6  ;;  %1220 = vmatprep.mubr.msk.bf16.mxu0 %vm1478_vm1, %v1477_v7  ;;  %p1422_p1 = scmp.lt.s32.totalorder %s1420_s24, %s1414_s21 }
  0x1f   : > { %1218 = vmatprep.subr.bf16.mxu0 %v1477_v7  ;;  %679 = vperm.xlu1 %1328, %v635_v44   ;;  %p1416_p12 = pnand %p1415_p11, %p1566_p5 }
  0x20   : > { %p1423_p2 = por %p1422_p1, %p1421_p0 }
  0x21   : > { %p1417_p13 = pneg %p1416_p12 }
  0x22   : > { %1219 = vmatpush3.bf16.msra.mxu0 %v1337_v8 }
  0x23   : > { %670 = vperm.xlu1 %1328, %v632_v45   ;;  %p1424_p3 = pnand %p1423_p2, %p1417_p13 }
  0x25   : > { %1221 = vmatmul.mubr.msk.bf16.vlgmr.msra.gmra.mxu0 %vm369_vm0, %v1335_v5 }
  0x27   : > { %673 = vperm.xlu1 %1328, %v633_v46  }
  0x2b   : > { %664 = vperm.xlu1 %1328, %v630_v47  }
  0x2f   : > { %667 = vperm.xlu1 %1328, %v631_v48   ;;  %v1479_v48 = vmov -1e+30  }
  0x33   : > { %658 = vperm.xlu1 %1328, %v628_v49  }
  0x37   : > { %661 = vperm.xlu1 %1328, %v629_v51  }
  0x3b   : > { %652 = vperm.xlu1 %1328, %v626_v53  }
  0x3f   : > { %655 = vperm.xlu1 %1328, %v627_v58  }
  0x43   : > { %649 = vperm.xlu1 %1328, %v625_v0  }
  0xdd   : > { %v407_v15 = vpop.f32.mrf.mxu0 }
  0xde   : > { %v408_v18 = vadd.f32 %v407_v15, %v320_v14 }
  0xdf   : > { %v409_v17 = vpop.f32.mrf.mxu0 }
  0xe0   : > { %v410_v20 = vadd.f32 %v409_v17, %v324_v16  ;;  %v458_v23 = vmul.f32 %v408_v18, %v408_v18 }
  0xe1   : > { %v411_v19 = vpop.f32.mrf.mxu0 }
  0xe2   : > { %v412_v21 = vadd.f32 %v411_v19, %v320_v14  ;;  %v469_v26 = vmul.f32 %v410_v20, %v410_v20  ;;  %v686_v14 = vpop.permute.xlu1 %685 }
  0xe3   : > { %v413_v22 = vpop.f32.mrf.mxu0  ;;  %vm706_vm4 = vcmp.eq.s32.totalorder %v686_v14, %v1712_v42 }
  0xe4   : > { %v459_v24 = vmul.f32 %v412_v21, %v412_v21  ;;  %v414_v25 = vadd.f32 %v413_v22, %v324_v16 }
  0xe5   : > { %v450_v54 = vpop.f32.mrf.mxu0 }
  0xe6   : > { %v460_v27 = vadd.f32 %v459_v24, %v458_v23  ;;  %v470_v28 = vmul.f32 %v414_v25, %v414_v25  ;;  %v483_v29 = vpack.c.bf16 %v414_v25, %v410_v20  ;;  %v1655_v57 = vadd.f32 %v450_v54, %v328_v52  ;;  %v677_v17 = vpop.permute.xlu1 %676 }
  0xe7   : > { %v1222_v56 = vpop.f32.mrf.mxu0  ;;  %vm703_vm5 = vcmp.eq.s32.totalorder %v677_v17, %v1712_v42 }
  0xe8   : > { %v461_v30 = vrot.slane %v460_v27, 4  ;;  %v1617_v31 = vadd.f32 %v470_v28, %v469_v26  ;;  %1224 = vmatprep.subr.bf16.mxu0 %v483_v29  ;;  %v719_v10 = vsel %vm703_vm5, 0.0, %v1479_v48 }
  0xe9   : > { %1225 = vmatpush3.bf16.msra.mxu0 %v483_v29  ;;  %v453_v59 = vpop.f32.mrf.mxu0 }
  0xea   : > { %v462_v32 = vadd.f32 %v461_v30, %v460_v27  ;;  %1262 = vmatprep.subr.bf16.mxu0 %v1477_v7  ;;  %v1663_v61 = vadd.f32 %v453_v59, %v328_v52  ;;  %v472_v15 = vrot.slane %v1617_v31, 4  ;;  %v680_v19 = vpop.permute.xlu1 %679 }
  0xeb   : > { %v1223_v62 = vpop.f32.mrf.mxu0  ;;  %vm704_vm7 = vcmp.eq.s32.totalorder %v680_v19, %v1712_v42 }
  0xec   : > { %v463_v33 = vrot.slane %v462_v32, 2  ;;  %v457_v63 = vpack.c.bf16 %v1663_v61, %v1655_v57  ;;  %v473_v16 = vadd.f32 %v472_v15, %v1617_v31 }
  0xee   : > { %v464_v34 = vadd.f32 %v463_v33, %v462_v32  ;;  %v671_v22 = vpop.permute.xlu1 %670 }
  0xef   : > { %vm701_vm8 = vcmp.eq.s32.totalorder %v671_v22, %v1712_v42 }
  0xf0   : > { %v465_v35 = vrot.slane %v464_v34, 1 }
  0xf2   : > { %v466_v36 = vadd.f32 %v465_v35, %v464_v34  ;;  %v674_v24 = vpop.permute.xlu1 %673 }
  0xf3   : > { %vm702_vm6 = vcmp.eq.s32.totalorder %v674_v24, %v1712_v42 }
  0xf4   : > { %v467_v37 = vmax.f32 %v466_v36, 1e-24 }
  0xf6   : > { %1346 = vrsqrt.f32 %v467_v37  ;;  %v1692_v28 = vpop.permute.xlu1 %664  ;;  %v723_v37 = vld [vmem:[%s2001_s5] sm:$0x1] }
  0xf7   : > { %vm699_vm10 = vcmp.eq.s32.totalorder %v1692_v28, %v1712_v42 }
  0xfa   : > { %v668_v32 = vpop.permute.xlu1 %667 }
  0xfb   : > { %vm700_vm9 = vcmp.eq.s32.totalorder %v668_v32, %v1712_v42 }
 0x103   : > { %v1347_v38 = vpop.eup %1346 }
 0x104   : > { %v480_v39 = vmul.f32 %v1347_v38, %v408_v18  ;;  %v481_v40 = vmul.f32 %v1347_v38, %v412_v21  ;;  %v474_v18 = vrot.slane %v473_v16, 2  ;;  %v1707_v38 = vpop.permute.xlu1 %658 }
 0x105   : > { %vm697_vm12 = vcmp.eq.s32.totalorder %v1707_v38, %v1712_v42 }
 0x106   : > { %v482_v41 = vpack.c.bf16 %v481_v40, %v480_v39  ;;  %v475_v20 = vadd.f32 %v474_v18, %v473_v16  ;;  %v715_v18 = vsel %vm699_vm10, 0.0, %v1479_v48 }
 0x108   : > { %484 = vxpose.xlu0.c.b16.start.end [1/1] (short) %v482_v41, 128  ;;  %v476_v21 = vrot.slane %v475_v20, 1  ;;  %v662_v45 = vpop.permute.xlu1 %661 }
 0x109   : > { %vm698_vm11 = vcmp.eq.s32.totalorder %v662_v45, %v1712_v42 }
 0x10a   : > { %v477_v23 = vadd.f32 %v476_v21, %v475_v20  ;;  %v714_v19 = vsel %vm698_vm11, 0.0, %v1479_v48 }
 0x10c   : > { %v478_v25 = vmax.f32 %v477_v23, 1e-24 }
 0x10e   : > { %1348 = vrsqrt.f32 %v478_v25  ;;  %v713_v25 = vsel %vm697_vm12, 0.0, %v1479_v48 }
 0x111   : > { %1327 = vset.pattern.permute.xlu0 %v1476_v2  ;;  %v623_v2 = vld [vmem:[%s2002_s6 + $0x8] sm:$0xff] }
 0x112   : > { %643 = vperm.xlu1 %1328, %v623_v2   ;;  %v718_v2 = vsel %vm702_vm6, 0.0, %v1479_v48 }
 0x11b   : > { %v1349_v36 = vpop.eup %1348 }
 0x11c   : > { %v724_v41 = vmul.f32 %v1349_v36, %v723_v37 }
 0x11e   : > { %v1717_v47 = vrot.slane %v724_v41, %v319_v11  ;;  %v653_v11 = vpop.permute.xlu1 %652 }
 0x11f   : > { %vm695_vm14 = vcmp.eq.s32.totalorder %v653_v11, %v1712_v42 }
 0x120   : > { %v711_v38 = vsel %vm695_vm14, 0.0, %v1479_v48 }
 0x12d   : > { %682 = vperm.xlu0 %1327, %v636_v55   ;;  %v722_v55 = vsel %vm706_vm4, 0.0, %v1479_v48 }
 0x131   : > { %646 = vperm.xlu0 %1327, %v624_v60  }
 0x135   : > { %640 = vperm.xlu0 %1327, %v622_v1  }
 0x16a   : > { %v492_v3 = vpop.trf.xlu0 }
 0x16b   : > { %1226 = vmatprep.mubr.msk.bf16.mxu0 %vm500_vm2, %v492_v3  ;;  %v720_v3 = vsel %vm704_vm7, 0.0, %v1479_v48 }
 0x16e   : > { %v493_v4 = vpop.trf.xlu0 }
 0x16f   : > { %1227 = vmatmul.mubr.msk.bf16.vlgmr.msra.gmra.mxu0 %vm500_vm2, %v493_v4  ;;  %v656_v4 = vpop.permute.xlu1 %655 }
 0x170   : > { %vm696_vm13 = vcmp.eq.s32.totalorder %v656_v4, %v1712_v42 }
 0x171   : > { %v712_v28 = vsel %vm696_vm13, 0.0, %v1479_v48 }
 0x172   : > { %v494_v5 = vpop.trf.xlu0 }
 0x173   : > { %1230 = vmatprep.mubr.msk.bf16.mxu0 %vm500_vm2, %v494_v5  ;;  %v650_v20 = vpop.permute.xlu1 %649 }
 0x174   : > { %vm694_vm15 = vcmp.eq.s32.totalorder %v650_v20, %v1712_v42 }
 0x176   : > { %v495_v6 = vpop.trf.xlu0 }
 0x177   : > { %1231 = vmatmul.mubr.msk.bf16.gmra.mxu0 %vm500_vm2, %v495_v6 }
 0x17a   : > { %v496_v8 = vpop.trf.xlu0 }
 0x17b   : > { %1234 = vmatprep.mubr.msk.bf16.mxu0 %vm500_vm2, %v496_v8 }
 0x17e   : > { %v497_v9 = vpop.trf.xlu0 }
 0x17f   : > { %1235 = vmatmul.mubr.msk.bf16.gmra.mxu0 %vm500_vm2, %v497_v9 }
 0x182   : > { %v498_v12 = vpop.trf.xlu0 }
 0x183   : > { %1238 = vmatprep.mubr.msk.bf16.mxu0 %vm500_vm2, %v498_v12  ;;  %v717_v12 = vsel %vm701_vm8, 0.0, %v1479_v48 }
 0x186   : > { %v499_v13 = vpop.trf.xlu0 }
 0x187   : > { %1239 = vmatmul.mubr.msk.bf16.gmra.mxu0 %vm500_vm2, %v499_v13  ;;  %v716_v13 = vsel %vm700_vm9, 0.0, %v1479_v48 }
 0x188   : > { %1278 = vmatprep.mubr.msk.bf16.mxu0 %vm1478_vm1, %v1477_v7 }
 0x1a8   : > { %v683_v43 = vpop.permute.xlu0 %682 }
 0x1a9   : > { %vm705_vm3 = vcmp.eq.s32.totalorder %v683_v43, %v1712_v42 }
 0x1aa   : > { %v721_v49 = vsel %vm705_vm3, 0.0, %v1479_v48 }
 0x1ac   : > { %v647_v32 = vpop.permute.xlu0 %646 }
 0x1ad   : > { %vm693_vm0 = vcmp.eq.s32.totalorder %v647_v32, %v1712_v42 }
 0x22f   : > { %v1688_v26 = vpop.f32.mrf.mxu0 }
 0x231   : > { %v1690_v27 = vpop.f32.mrf.mxu0 }
 0x233   : > { %v1694_v29 = vpop.f32.mrf.mxu0 }
 0x235   : > { %v1696_v30 = vpop.f32.mrf.mxu0 }
 0x237   : > { %v1698_v31 = vpop.f32.mrf.mxu0 }
 0x238   : > { %v735_v21 = vmul.f32 %v1698_v31, %v1717_v47  ;;  %v644_v31 = vpop.permute.xlu1 %643 }
 0x239   : > { %v1700_v33 = vpop.f32.mrf.mxu0  ;;  %vm692_vm1 = vcmp.eq.s32.totalorder %v644_v31, %v1712_v42 }
 0x23a   : > { %v1790_v37 = vadd.f32 %v735_v21, %v713_v25  ;;  %v708_v45 = vsel %vm692_vm1, 0.0, %v1479_v48 }
 0x23b   : > { %v1233_v34 = vpop.f32.mrf.mxu0 }
 0x23c   : > { %v736_v14 = vmul.f32 %v1233_v34, %v1717_v47  ;;  %v732_v34 = vmul.f32 %v1694_v29, %v1717_v47  ;;  %v641_v29 = vpop.permute.xlu0 %640 }
 0x23d   : > { %v1702_v35 = vpop.f32.mrf.mxu0  ;;  %vm691_vm2 = vcmp.eq.s32.totalorder %v641_v29, %v1712_v42 }
 0x23e   : > { %v734_v22 = vmul.f32 %v1717_v47, %v1702_v35  ;;  %v1774_v23 = vadd.f32 %v736_v14, %v714_v19  ;;  %v733_v35 = vmul.f32 %v1717_v47, %v1700_v33  ;;  %v731_v33 = vmul.f32 %v1688_v26, %v1717_v47 }
 0x23f   : > { %v1236_v39 = vpop.f32.mrf.mxu0  ;;  %v729_v26 = vmul.f32 %v1717_v47, %v1690_v27 }
 0x240   : > { %v739_v5 = vmul.f32 %v1236_v39, %v1717_v47  ;;  %v1788_v36 = vadd.f32 %v734_v22, %v712_v28  ;;  %v710_v39 = vsel %vm694_vm15, 0.0, %v1479_v48  ;;  %v1804_v43 = vadd.f32 %v733_v35, %v711_v38 }
 0x241   : > { %v591_v40 = vpop.f32.mrf.mxu0  ;;  %v1802_v41 = vadd.f32 %v732_v34, %v710_v39 }
 0x242   : > { %v737_v15 = vmul.f32 %v1717_v47, %v591_v40  ;;  %v1761_v17 = vadd.f32 %v739_v5, %v717_v12  ;;  %v730_v40 = vmul.f32 %v1717_v47, %v1696_v30 }
 0x243   : > { %v1237_v44 = vpop.f32.mrf.mxu0 }
 0x244   : > { %v740_v60 = vmul.f32 %v1237_v44, %v1717_v47  ;;  %v1776_v24 = vadd.f32 %v737_v15, %v715_v18  ;;  %v709_v44 = vsel %vm693_vm0, 0.0, %v1479_v48 }
 0x245   : > { %v594_v46 = vpop.f32.mrf.mxu0  ;;  %v1815_v30 = vadd.f32 %v731_v33, %v709_v44 }
 0x246   : > { %v738_v6 = vmul.f32 %v1717_v47, %v594_v46  ;;  %v1746_v8 = vadd.f32 %v740_v60, %v718_v2  ;;  %v1813_v46 = vadd.f32 %v730_v40, %v708_v45 }
 0x247   : > { %v1240_v50 = vpop.f32.mrf.mxu0 }
 0x248   : > { %v743_v51 = vmul.f32 %v1240_v50, %v1717_v47  ;;  %v1759_v16 = vadd.f32 %v738_v6, %v716_v13 }
 0x249   : > { %v607_v52 = vpop.f32.mrf.mxu0 }
 0x24a   : > { %v741_v53 = vmul.f32 %v1717_v47, %v607_v52  ;;  %v1724_v54 = vadd.f32 %v743_v51, %v721_v49  ;;  %v707_v49 = vsel %vm691_vm2, 0.0, %v1479_v48 }
 0x24b   : > { %v1241_v56 = vpop.f32.mrf.mxu0  ;;  %v1820_v50 = vadd.f32 %v729_v26, %v707_v49 }
 0x24c   : > { %v744_v58 = vmul.f32 %v1241_v56, %v1717_v47  ;;  %789 = vmax.xlane.f32.xlu0 %v1724_v54  ;;  %v1736_v1 = vadd.f32 %v741_v53, %v719_v10 }
 0x24d   : > { %v610_v59 = vpop.f32.mrf.mxu0 }
 0x24e   : > { %v742_v62 = vmul.f32 %v1717_v47, %v610_v59  ;;  %v1734_v0 = vadd.f32 %v744_v58, %v722_v55 }
 0x250   : > { %791 = vmax.xlane.f32.xlu1 %v1734_v0  ;;  %785 = vmax.xlane.f32.xlu0 %v1736_v1  ;;  %v1748_v9 = vadd.f32 %v742_v62, %v720_v3 }
 0x254   : > { %783 = vmax.xlane.f32.xlu1 %v1746_v8  ;;  %787 = vmax.xlane.f32.xlu0 %v1748_v9 }
 0x258   : > { %779 = vmax.xlane.f32.xlu1 %v1759_v16  ;;  %781 = vmax.xlane.f32.xlu0 %v1761_v17 }
 0x25c   : > { %775 = vmax.xlane.f32.xlu1 %v1774_v23  ;;  %777 = vmax.xlane.f32.xlu0 %v1776_v24 }
 0x260   : > { %771 = vmax.xlane.f32.xlu1 %v1788_v36  ;;  %773 = vmax.xlane.f32.xlu0 %v1790_v37 }
 0x264   : > { %767 = vmax.xlane.f32.xlu1 %v1802_v41  ;;  %769 = vmax.xlane.f32.xlu0 %v1804_v43 }
 0x268   : > { %763 = vmax.xlane.f32.xlu1 %v1813_v46  ;;  %765 = vmax.xlane.f32.xlu0 %v1815_v30 }
 0x26c   : > { %761 = vmax.xlane.f32.xlu0 %v1820_v50 }
 0x2d5   : > { %v790_v42 = vpop.xlane.xlu0 %789 }
 0x2d6   : > { %v807_v51 = vsub.f32 %v1724_v54, %v790_v42 }
 0x2d8   : > { %v837_v52 = vmul.f32 1.442695, %v807_v51 }
 0x2d9   : > { %v792_v53 = vpop.xlane.xlu1 %791  ;;  %v786_v27 = vpop.xlane.xlu0 %785 }
 0x2da   : > { %1350 = vpow2.f32 %v837_v52  ;;  %v808_v47 = vsub.f32 %v1734_v0, %v792_v53  ;;  %v805_v55 = vsub.f32 %v1736_v1, %v786_v27  ;;  %v1338_v27 = vld [vmem:[%s1999_s3 + $0x38] sm:$0xff]  }
 0x2db   : > { %1263 = vmatpush3.bf16.msra.mxu0 %v1338_v27 }
 0x2dc   : > { %v839_v48 = vmul.f32 1.442695, %v808_v47  ;;  %v833_v10 = vmul.f32 1.442695, %v805_v55  ;;  %v1339_v47 = vld [vmem:[%s1999_s3 + $0x30] sm:$0xff]   ;;  %1264 = vmatprep.subr.bf16.mxu0 %v1477_v7  ;;  %v1340_v55 = vld [vmem:[%s1999_s3 + $0x28] sm:$0xff]  }
 0x2dd   : > { %v784_v11 = vpop.xlane.xlu1 %783  ;;  %v788_v56 = vpop.xlane.xlu0 %787 }
 0x2de   : > { %1352 = vpow2.f32 %v839_v48  ;;  %v804_v58 = vsub.f32 %v1746_v8, %v784_v11  ;;  %v806_v59 = vsub.f32 %v1748_v9, %v788_v56  ;;  %v1341_v48 = vld [vmem:[%s1999_s3 + $0x20] sm:$0xff]   ;;  %v1343_v11 = vld [vmem:[%s1999_s3 + $0x10] sm:$0xff]   ;;  %v1344_v56 = vld [vmem:[%s1999_s3 + $0x8] sm:$0xff]  }
 0x2df   : > { %1354 = vpow2.f32 %v833_v10  ;;  %1265 = vmatpush3.bf16.msra.mxu0 %v1339_v47  ;;  %v1342_v10 = vld [vmem:[%s1999_s3 + $0x18] sm:$0xff]  }
 0x2e0   : > { %v835_v60 = vmul.f32 1.442695, %v806_v59  ;;  %v831_v2 = vmul.f32 1.442695, %v804_v58  ;;  %1266 = vmatprep.subr.bf16.mxu0 %v1477_v7 }
 0x2e1   : > { %v780_v54 = vpop.xlane.xlu1 %779  ;;  %v782_v62 = vpop.xlane.xlu0 %781 }
 0x2e2   : > { %v802_v3 = vsub.f32 %v1759_v16, %v780_v54  ;;  %v803_v0 = vsub.f32 %v1761_v17, %v782_v62  ;;  %1356 = vpow2.f32 %v835_v60 }
 0x2e3   : > { %1358 = vpow2.f32 %v831_v2  ;;  %1267 = vmatpush3.bf16.msra.mxu0 %v1340_v55 }
 0x2e4   : > { %v829_v1 = vmul.f32 1.442695, %v803_v0  ;;  %v827_v6 = vmul.f32 1.442695, %v802_v3  ;;  %1268 = vmatprep.subr.bf16.mxu0 %v1477_v7 }
 0x2e5   : > { %v776_v4 = vpop.xlane.xlu1 %775  ;;  %v778_v5 = vpop.xlane.xlu0 %777 }
 0x2e6   : > { %v800_v12 = vsub.f32 %v1774_v23, %v776_v4  ;;  %v801_v8 = vsub.f32 %v1776_v24, %v778_v5  ;;  %1360 = vpow2.f32 %v829_v1 }
 0x2e7   : > { %v1832_v9 = vpop.eup %1350  ;;  %1362 = vpow2.f32 %v827_v6  ;;  %1269 = vmatpush3.bf16.msra.mxu0 %v1341_v48 }
 0x2e8   : > { %v825_v13 = vmul.f32 1.442695, %v801_v8  ;;  %869 = vadd.xlane.f32.xlu0 %v1832_v9  ;;  %v823_v16 = vmul.f32 1.442695, %v800_v12  ;;  %1270 = vmatprep.subr.bf16.mxu0 %v1477_v7 }
 0x2e9   : > { %v772_v14 = vpop.xlane.xlu1 %771  ;;  %v774_v15 = vpop.xlane.xlu0 %773 }
 0x2ea   : > { %v798_v17 = vsub.f32 %v1788_v36, %v772_v14  ;;  %v799_v18 = vsub.f32 %v1790_v37, %v774_v15  ;;  %1364 = vpow2.f32 %v825_v13 }
 0x2eb   : > { %v1837_v19 = vpop.eup %1352  ;;  %1366 = vpow2.f32 %v823_v16  ;;  %1271 = vmatpush3.bf16.msra.mxu0 %v1342_v10 }
 0x2ec   : > { %v1839_v20 = vpop.eup %1354  ;;  %v821_v21 = vmul.f32 1.442695, %v799_v18  ;;  %871 = vadd.xlane.f32.xlu1 %v1837_v19  ;;  %v819_v24 = vmul.f32 1.442695, %v798_v17  ;;  %1272 = vmatprep.subr.bf16.mxu0 %v1477_v7 }
 0x2ed   : > { %865 = vadd.xlane.f32.xlu0 %v1839_v20  ;;  %v768_v22 = vpop.xlane.xlu1 %767  ;;  %v770_v23 = vpop.xlane.xlu0 %769 }
 0x2ee   : > { %v796_v25 = vsub.f32 %v1802_v41, %v768_v22  ;;  %v797_v28 = vsub.f32 %v1804_v43, %v770_v23  ;;  %1368 = vpow2.f32 %v821_v21 }
 0x2ef   : > { %v1845_v32 = vpop.eup %1356  ;;  %1370 = vpow2.f32 %v819_v24  ;;  %1273 = vmatpush3.bf16.msra.mxu0 %v1343_v11 }
 0x2f0   : > { %v817_v31 = vmul.f32 1.442695, %v797_v28  ;;  %867 = vadd.xlane.f32.xlu1 %v1845_v32  ;;  %v815_v36 = vmul.f32 1.442695, %v796_v25  ;;  %v1849_v38 = vpop.eup %1358  ;;  %1274 = vmatprep.subr.bf16.mxu0 %v1477_v7 }
 0x2f1   : > { %v764_v34 = vpop.xlane.xlu1 %763  ;;  %v766_v35 = vpop.xlane.xlu0 %765 }
 0x2f2   : > { %v795_v37 = vsub.f32 %v1815_v30, %v766_v35  ;;  %1372 = vpow2.f32 %v817_v31  ;;  %v794_v39 = vsub.f32 %v1813_v46, %v764_v34 }
 0x2f3   : > { %v1852_v29 = vpop.eup %1360  ;;  %1374 = vpow2.f32 %v815_v36  ;;  %1275 = vmatpush3.bf16.msra.mxu0 %v1344_v56 }
 0x2f4   : > { %v813_v33 = vmul.f32 1.442695, %v795_v37  ;;  %863 = vadd.xlane.f32.xlu1 %v1849_v38  ;;  %861 = vadd.xlane.f32.xlu0 %v1852_v29  ;;  %v1857_v43 = vpop.eup %1362  ;;  %v811_v44 = vmul.f32 1.442695, %v794_v39 }
 0x2f5   : > { %v762_v40 = vpop.xlane.xlu0 %761  ;;  %1276 = vmatprep.subr.bf16.mxu0 %v1477_v7 }
 0x2f6   : > { %v793_v41 = vsub.f32 %v1820_v50, %v762_v40  ;;  %1376 = vpow2.f32 %v813_v33 }
 0x2f7   : > { %v1859_v45 = vpop.eup %1364 }
 0x2f8   : > { %v809_v26 = vmul.f32 1.442695, %v793_v41  ;;  %859 = vadd.xlane.f32.xlu1 %v1857_v43  ;;  %857 = vadd.xlane.f32.xlu0 %v1859_v45  ;;  %v1863_v46 = vpop.eup %1366 }
 0x2fa   : > { %1378 = vpow2.f32 %v809_v26 }
 0x2fb   : > { %1380 = vpow2.f32 %v811_v44  ;;  %v1865_v30 = vpop.eup %1368 }
 0x2fc   : > { %855 = vadd.xlane.f32.xlu1 %v1863_v46  ;;  %853 = vadd.xlane.f32.xlu0 %v1865_v30  ;;  %v1869_v49 = vpop.eup %1370 }
 0x2ff   : > { %v1871_v50 = vpop.eup %1372 }
 0x300   : > { %851 = vadd.xlane.f32.xlu1 %v1869_v49  ;;  %849 = vadd.xlane.f32.xlu0 %v1871_v50  ;;  %v1875_v42 = vpop.eup %1374 }
 0x303   : > { %v1877_v51 = vpop.eup %1376 }
 0x304   : > { %847 = vadd.xlane.f32.xlu1 %v1875_v42  ;;  %845 = vadd.xlane.f32.xlu0 %v1877_v51 }
 0x307   : > { %v1881_v52 = vpop.eup %1378 }
 0x308   : > { %v1883_v53 = vpop.eup %1380  ;;  %841 = vadd.xlane.f32.xlu0 %v1881_v52 }
 0x309   : > { %843 = vadd.xlane.f32.xlu1 %v1883_v53 }
 0x371   : > { %v870_v58 = vpop.xlane.xlu0 %869 }
 0x372   : > { %1382 = vrcp.f32 %v870_v58 }
 0x375   : > { %v872_v59 = vpop.xlane.xlu1 %871 }
 0x376   : > { %1384 = vrcp.f32 %v872_v59  ;;  %v866_v60 = vpop.xlane.xlu0 %865 }
 0x379   : > { %v868_v54 = vpop.xlane.xlu1 %867 }
 0x37a   : > { %1386 = vrcp.f32 %v868_v54 }
 0x37b   : > { %1388 = vrcp.f32 %v866_v60 }
 0x37d   : > { %v864_v62 = vpop.xlane.xlu1 %863  ;;  %v862_v2 = vpop.xlane.xlu0 %861 }
 0x37e   : > { %1390 = vrcp.f32 %v864_v62 }
 0x37f   : > { %v1383_v3 = vpop.eup %1382  ;;  %1392 = vrcp.f32 %v862_v2 }
 0x380   : > { %v903_v1 = vmul.f32 %v1383_v3, %v1832_v9 }
 0x381   : > { %v860_v5 = vpop.xlane.xlu1 %859  ;;  %v858_v12 = vpop.xlane.xlu0 %857 }
 0x382   : > { %1394 = vrcp.f32 %v860_v5 }
 0x383   : > { %v1385_v0 = vpop.eup %1384  ;;  %1396 = vrcp.f32 %v858_v12 }
 0x384   : > { %v904_v4 = vmul.f32 %v1385_v0, %v1837_v19 }
 0x385   : > { %v856_v17 = vpop.xlane.xlu1 %855  ;;  %v854_v21 = vpop.xlane.xlu0 %853 }
 0x386   : > { %v912_v6 = vpack.c.bf16 %v904_v4, %v903_v1  ;;  %1398 = vrcp.f32 %v856_v17 }
 0x387   : > { %v1387_v8 = vpop.eup %1386  ;;  %1400 = vrcp.f32 %v854_v21 }
 0x388   : > { %1243 = vmatpush3.bf16.xpose.msra.mxu1 %v912_v6  ;;  %v1389_v13 = vpop.eup %1388  ;;  %v902_v14 = vmul.f32 %v1387_v8, %v1845_v32 }
 0x389   : > { %1244 = vmatprep.subr.bf16.mxu1 %v1477_v7  ;;  %v901_v15 = vmul.f32 %v1389_v13, %v1839_v20  ;;  %v852_v24 = vpop.xlane.xlu1 %851  ;;  %v850_v32 = vpop.xlane.xlu0 %849 }
 0x38a   : > { %1402 = vrcp.f32 %v852_v24 }
 0x38b   : > { %v1391_v16 = vpop.eup %1390  ;;  %v911_v18 = vpack.c.bf16 %v902_v14, %v901_v15  ;;  %1404 = vrcp.f32 %v850_v32 }
 0x38c   : > { %v1393_v9 = vpop.eup %1392  ;;  %v900_v22 = vmul.f32 %v1391_v16, %v1849_v38 }
 0x38d   : > { %v899_v19 = vmul.f32 %v1393_v9, %v1852_v29  ;;  %v848_v35 = vpop.xlane.xlu1 %847  ;;  %v846_v39 = vpop.xlane.xlu0 %845 }
 0x38e   : > { %1406 = vrcp.f32 %v848_v35 }
 0x38f   : > { %v1395_v23 = vpop.eup %1394  ;;  %v910_v25 = vpack.c.bf16 %v900_v22, %v899_v19  ;;  %1408 = vrcp.f32 %v846_v39 }
 0x390   : > { %1245 = vmatpush3.bf16.xpose.msra.mxu1 %v911_v18  ;;  %v1397_v28 = vpop.eup %1396  ;;  %v898_v31 = vmul.f32 %v1395_v23, %v1857_v43 }
 0x391   : > { %1246 = vmatprep.subr.bf16.mxu1 %v1477_v7  ;;  %v897_v20 = vmul.f32 %v1397_v28, %v1859_v45  ;;  %v842_v45 = vpop.xlane.xlu0 %841 }
 0x392   : > { %v844_v40 = vpop.xlane.xlu1 %843 }
 0x393   : > { %v1399_v34 = vpop.eup %1398  ;;  %v909_v36 = vpack.c.bf16 %v898_v31, %v897_v20  ;;  %1410 = vrcp.f32 %v844_v40 }
 0x394   : > { %v1401_v37 = vpop.eup %1400  ;;  %v896_v29 = vmul.f32 %v1399_v34, %v1863_v46  ;;  %1412 = vrcp.f32 %v842_v45 }
 0x395   : > { %v895_v38 = vmul.f32 %v1401_v37, %v1865_v30 }
 0x397   : > { %v1403_v33 = vpop.eup %1402  ;;  %v908_v41 = vpack.c.bf16 %v896_v29, %v895_v38 }
 0x398   : > { %1247 = vmatpush3.bf16.xpose.msra.mxu1 %v910_v25  ;;  %v1405_v44 = vpop.eup %1404  ;;  %v894_v26 = vmul.f32 %v1403_v33, %v1869_v49 }
 0x399   : > { %1248 = vmatprep.subr.bf16.mxu1 %v1477_v7  ;;  %v893_v43 = vmul.f32 %v1405_v44, %v1871_v50 }
 0x39b   : > { %v1407_v27 = vpop.eup %1406  ;;  %v907_v47 = vpack.c.bf16 %v894_v26, %v893_v43 }
 0x39c   : > { %v1409_v55 = vpop.eup %1408  ;;  %v892_v30 = vmul.f32 %v1407_v27, %v1875_v42  ;;  %v1345_v42 = vld [vmem:[%s1999_s3] sm:$0xff]  }
 0x39d   : > { %v891_v46 = vmul.f32 %v1409_v55, %v1877_v51  ;;  %1277 = vmatpush3.bf16.msra.mxu0 %v1345_v42 }
 0x39f   : > { %v906_v10 = vpack.c.bf16 %v892_v30, %v891_v46 }
 0x3a0   : > { %1249 = vmatpush3.bf16.xpose.msra.mxu1 %v909_v36  ;;  %v1411_v48 = vpop.eup %1410 }
 0x3a1   : > { %1250 = vmatprep.subr.bf16.mxu1 %v1477_v7  ;;  %v1413_v11 = vpop.eup %1412  ;;  %v890_v49 = vmul.f32 %v1411_v48, %v1883_v53 }
 0x3a2   : > { %v889_v50 = vmul.f32 %v1413_v11, %v1881_v52  ;;  %v1170_v52 = vld [vmem:[%s2000_s4] ss:$0 sm:$0xff] }
 0x3a4   : > { %v905_v56 = vpack.c.bf16 %v890_v49, %v889_v50 }
 0x3a8   : > { %1251 = vmatpush3.bf16.xpose.msra.mxu1 %v908_v41 }
 0x3a9   : > { %1252 = vmatprep.subr.bf16.mxu1 %v1477_v7 }
 0x3b0   : > { %1253 = vmatpush3.bf16.xpose.msra.mxu1 %v907_v47 }
 0x3b1   : > { %1254 = vmatprep.subr.bf16.mxu1 %v1477_v7 }
 0x3b8   : > { %1255 = vmatpush3.bf16.xpose.msra.mxu1 %v906_v10 }
 0x3b9   : > { %1256 = vmatprep.subr.bf16.mxu1 %v1477_v7 }
 0x3c0   : > { %1257 = vmatpush3.bf16.xpose.msra.mxu1 %v905_v56 }
 0x3c7   : > { %1259 = vmatmul.mubr.bf16.vlgmr.msra.gmra.mxu1 %v457_v63 }
 0x487   : > { %v947_v51 = vpop.f32.mrf.mxu1 }
 0x489   : > { %v1260_v58 = vpop.f32.mrf.mxu1 }
 0x48b   : > { %v950_v59 = vpop.f32.mrf.mxu1 }
 0x48c   : > { %v954_v7 = vpack.c.bf16 %v950_v59, %v947_v51 }
 0x48d   : > { %v1261_v60 = vpop.f32.mrf.mxu1 }
 0x48e   : > { %1279 = vmatmul.mubr.bf16.vlgmr.msra.gmra.mxu0 %v954_v7 }
 0x54e   : > { %v1060_v57 = vpop.f32.mrf.mxu0 }
 0x54f   : > { %v1061_v61 = vadd.f32 %v1170_v52, %v1060_v57 }
 0x550   : > { %v1280_v63 = vpop.f32.mrf.mxu0 }
 0x551   : > { %1067 = vst [vmem:[%s298_s10] sm:$0xff] %v1061_v61 }
 0x552   : > { %v1063_v53 = vpop.f32.mrf.mxu0 }
 0x553   : > { %v1064_v54 = vadd.f32 %v1170_v52, %v1063_v53 }
 0x554   : > { %v1281_v62 = vpop.f32.mrf.mxu0 }
 0x555   : > { %1068 = vst [vmem:[%s298_s10 + $0x8] sm:$0xff] %v1064_v54 }
 0x556   : > { %1427 = shalt.err (!%p1424_p3)
}
 0x557   : > { %s1428_s23 = scalar_lea.hbm %s1954_s19, 256  ;;  %s1432_s10 = scalar_lea.hbm %s2004_s8, 512 }
 0x558   : > { %p1429_p4 = scmp.ne.s32.totalorder %s1954_s19, %s1428_s23  ;;  %p1433_p9 = scmp.lt.s32.totalorder %s1954_s19, %s2004_s8 }
 0x559   : > { %p1434_p10 = scmp.lt.s32.totalorder %s1432_s10, %s1428_s23 }
 0x55a   : > { %p1430_p7 = pnand %p1429_p4, %p1566_p5 }
 0x55b   : > { %p1435_p11 = por %p1434_p10, %p1433_p9 }
 0x55c   : > { %p1431_p8 = pneg %p1430_p7 }
 0x55e   : > { %p1436_p12 = pnand %p1435_p11, %p1431_p8 }
 0x560   : > { %1439 = shalt.err (!%p1436_p12)
}
 0x561   : > { %s1481_s18 = smov 128   ;;  %s1482_s21 = smov 8  }
 0x562   : > { %1282 = dma.vmem_to_hbm [thread:$0]  (%p1566_p5), %s1949_s12, 256, %s1954_s19, %s1956_s20, %s1481_s18, %s1481_s18, %s1482_s21  }
 0x563 PF: > { %p1288_p13 = scmp.ge.s32.totalorder %s1474_s30, 2  ;;  %s1098_s9 = sand.u32 1, %s1462_s27  }
 0x564   : > { %s1099_s22 = scalar_lea.sflag [#allocation3], %s1098_s9 }
 0x565   : > { %p1285_p0 = pnand %p1288_p13, %p1570_p6 }
 0x567   : > { %p1286_p1 = pneg %p1285_p0 }
 0x569   : > { %1457 = dma.done.wait (%p1286_p1), %s1099_s22, 256  }
 0x56a   : > { %1459 = vsyncadd (%p1286_p1), %s1099_s22, 4294967040  ;;  %p18_p2 = scmp.ge.s32.totalorder %s1553_s11, 4   ;;  %s2007_s27 = smov %s1466_s28 }
 0x56b   : > { %s2008_s28 = smov %s1470_s29  ;;  %s2009_s29 = smov %s1564_s14 }
 0x56c   : > { %s2010_s30 = smov %s1553_s11  ;;  %20 = sbr.rel (!%p18_p2) target bundleno = 3 (0x3), region = 87 }
 0x571   :  { %1104 = vsyncpa [#allocation3], 1 }
 0x572   :  { %1106 = vsyncpa [#allocation3 + $0x1], 1 }

</bundles_post_ra>
